<compile_context>
chip_gen: v7x
topology: tpu7x:2x2x1
jax: 0.10.0
libtpu: 0.0.40
codegen_flags: <defaults>
</compile_context>

<pallas_src>
import jax
import jax.numpy as jnp
from jax.experimental import pallas as pl
from jax.experimental.pallas import tpu as pltpu

NUM_INPUTS = 28 * 28      # 784
NUM_OUTPUTS = 10
N_PAD = 128               # lane-dense padded output width
DEFAULT_TB = 2048         # batch tile (f32): ~15 MiB double-buffered VMEM
VMEM_LIMIT_BYTES = 32 * 1024 * 1024   # explicit scoped-VMEM budget (safe on v5e/v6e/v7x)


def _round_up(x, m):
    return (x + m - 1) // m * m


def linear_kernel(x_ref, w_ref, b_ref, o_ref):
    # x_ref: (TB, 784) f32 | w_ref: (784, 128) f32 (cols 10..127 are zero)
    # b_ref: (1, 128) f32  | o_ref: (TB, 128) f32
    y = jnp.dot(x_ref[...], w_ref[...], preferred_element_type=jnp.float32)
    o_ref[...] = y + b_ref[...]


def prepare_linear_params(weight, bias):
    """Pad PyTorch-layout (10, 784) weight / (10,) bias to the kernel's
    lane-dense (784, 128) / (1, 128) f32 layout. Hoist out of the hot path
    (call once) when weights are static across forward calls."""
    w_pad = jnp.zeros((NUM_INPUTS, N_PAD), jnp.float32)
    w_pad = w_pad.at[:, :NUM_OUTPUTS].set(weight.T.astype(jnp.float32))
    b_pad = jnp.zeros((1, N_PAD), jnp.float32)
    b_pad = b_pad.at[0, :NUM_OUTPUTS].set(bias.astype(jnp.float32))
    return w_pad, b_pad


def linear_net_forward(x_nchw, weight, bias, *, tb=DEFAULT_TB,
                       force_pallas=False, prepared_params=None):
    """LinearNet.forward: y = flatten(x) @ W.T + b.

    x_nchw : (B, C, H, W) float32  (C*H*W == 784)
    weight : (10, 784) float32     (PyTorch nn.Linear layout)
    bias   : (10,) float32
    returns: (B, 10) float32
    """
    B = x_nchw.shape[0]
    x2d = x_nchw.reshape(B, -1).astype(jnp.float32)   # x.view(x.shape[0], -1)

    # Tiny batches are pure launch overhead for a custom call; let XLA fuse the GEMV.
    if B < 256 and not force_pallas:
        return x2d @ weight.T.astype(jnp.float32) + bias.astype(jnp.float32)

    if prepared_params is None:
        prepared_params = prepare_linear_params(weight, bias)
    w_pad, b_pad = prepared_params

    # Batch tile: shrink for small batches (f32 -> 8-row sublane granularity);
    # ensure >= 2 grid steps when the batch allows so "parallel" actually feeds
    # both TensorCores on v7x.
    tb = min(tb, _round_up(B, 8))
    if B >= 512 and pl.cdiv(B, tb) < 2:
        tb = _round_up(pl.cdiv(B, 2), 256)
    grid = (pl.cdiv(B, tb),)

    cost = pl.CostEstimate(
        flops=2 * B * NUM_INPUTS * NUM_OUTPUTS,
        bytes_accessed=(B * NUM_INPUTS * 4          # x (f32), single pass
                        + NUM_INPUTS * N_PAD * 4    # W (f32), fetched once
                        + B * N_PAD * 4),           # out (f32)
        transcendentals=0,
    )

    out_padded = pl.pallas_call(
        linear_kernel,
        out_shape=jax.ShapeDtypeStruct((B, N_PAD), jnp.float32),
        grid=grid,
        in_specs=[
            pl.BlockSpec((tb, NUM_INPUTS), lambda i: (i, 0)),     # x: pipelined batch tiles
            pl.BlockSpec((NUM_INPUTS, N_PAD), lambda i: (0, 0)),  # W: constant block -> resident
            pl.BlockSpec((1, N_PAD), lambda i: (0, 0)),           # bias: resident
        ],
        out_specs=pl.BlockSpec((tb, N_PAD), lambda i: (i, 0)),
        compiler_params=pltpu.CompilerParams(
            dimension_semantics=("parallel",),     # independent batch tiles -> megacore on v7x
            vmem_limit_bytes=VMEM_LIMIT_BYTES,
        ),
        cost_estimate=cost,
    )(x2d, w_pad, b_pad)

    return out_padded[:, :NUM_OUTPUTS]


if __name__ == "__main__":
    key = jax.random.PRNGKey(0)
    kx, kw, kb = jax.random.split(key, 3)

    # Small NCHW input consistent with 28*28 flattened features.
    B = 2
    x = jax.random.normal(kx, (B, 1, 28, 28), dtype=jnp.float32)

    # PyTorch nn.Linear default init: U(-1/sqrt(fan_in), 1/sqrt(fan_in)).
    bound = 1.0 / (NUM_INPUTS ** 0.5)
    weight = jax.random.uniform(kw, (NUM_OUTPUTS, NUM_INPUTS),
                                minval=-bound, maxval=bound, dtype=jnp.float32)
    bias = jax.random.uniform(kb, (NUM_OUTPUTS,),
                              minval=-bound, maxval=bound, dtype=jnp.float32)

    # force_pallas=True so the Pallas path is exercised even at the demo's tiny batch.
    params = prepare_linear_params(weight, bias)
    y = linear_net_forward(x, weight, bias, force_pallas=True, prepared_params=params)
    jax.block_until_ready(y)

    # Correctness check against plain-JAX f32 reference. Tolerance covers the
    # MXU's internal bf16-pass rounding at default matmul precision.
    y_ref = x.reshape(B, -1) @ weight.T + bias
    assert y.shape == (B, NUM_OUTPUTS)
    assert jnp.allclose(y, y_ref, atol=2e-2, rtol=2e-2), float(jnp.max(jnp.abs(y - y_ref)))

    print("KERNEL_OK")
</pallas_src>

<mosaic_0001>
module attributes {stable_mosaic.version = 11 : i64} {
  func.func @linear_kernel(%arg0: i32, %arg1: memref<8x784xf32, #tpu.memory_space<vmem>>, %arg2: memref<784x128xf32, #tpu.memory_space<vmem>>, %arg3: memref<1x128xf32, #tpu.memory_space<vmem>>, %arg4: memref<8x128xf32, #tpu.memory_space<vmem>>) attributes {dimension_semantics = [#tpu.dimension_semantics<parallel>], iteration_bounds = array<i64: 1>, scalar_prefetch = 0 : i64, scratch_operands = 0 : i64, tpu.core_type = #tpu.core_type<tc>, window_params = [{transform_indices = @transform_0, window_bounds = array<i64: 8, 784>}, {pipeline_mode = #tpu.pipeline_mode<synchronous>, transform_indices = @transform_1, window_bounds = array<i64: 784, 128>}, {pipeline_mode = #tpu.pipeline_mode<synchronous>, transform_indices = @transform_2, window_bounds = array<i64: 1, 128>}, {transform_indices = @transform_3, window_bounds = array<i64: 8, 128>}]} {
    %c0 = arith.constant 0 : index
    %c0_0 = arith.constant 0 : index
    %0 = vector.load %arg1[%c0, %c0_0] : memref<8x784xf32, #tpu.memory_space<vmem>>, vector<8x784xf32>
    %c0_1 = arith.constant 0 : index
    %c0_2 = arith.constant 0 : index
    %1 = vector.load %arg2[%c0_1, %c0_2] : memref<784x128xf32, #tpu.memory_space<vmem>>, vector<784x128xf32>
    %cst = arith.constant dense<0.000000e+00> : vector<8x128xf32>
    %2 = tpu.matmul %0, %1, %cst {dimension_numbers = #tpu.dot_dimension_numbers<[1], [0], [0], [1], [0, 0, 1, 1], [], []>} : vector<8x784xf32>, vector<784x128xf32>, vector<8x128xf32> -> vector<8x128xf32>
    %c0_3 = arith.constant 0 : index
    %c0_4 = arith.constant 0 : index
    %3 = vector.load %arg3[%c0_3, %c0_4] : memref<1x128xf32, #tpu.memory_space<vmem>>, vector<1x128xf32>
    %4 = vector.broadcast %3 : vector<1x128xf32> to vector<8x128xf32>
    %5 = arith.addf %2, %4 : vector<8x128xf32>
    %c0_5 = arith.constant 0 : index
    %c0_6 = arith.constant 0 : index
    %6 = vector.load %arg4[%c0_5, %c0_6] : memref<8x128xf32, #tpu.memory_space<vmem>>, vector<8x128xf32>
    tpu.vector_store %arg4[%c0_5, %c0_6], %5 {strides = array<i32>} : memref<8x128xf32, #tpu.memory_space<vmem>>, vector<8x128xf32>,
    return
  }
  func.func @transform_0(%arg0: i32) -> (i32, i32) {
    %c0_i32 = arith.constant 0 : i32
    %c0_i32_0 = arith.constant 0 : i32
    return %arg0, %c0_i32 : i32, i32
  }
  func.func @transform_1(%arg0: i32) -> (i32, i32) {
    %c0_i32 = arith.constant 0 : i32
    %c0_i32_0 = arith.constant 0 : i32
    %c0_i32_1 = arith.constant 0 : i32
    return %c0_i32, %c0_i32_0 : i32, i32
  }
  func.func @transform_2(%arg0: i32) -> (i32, i32) {
    %c0_i32 = arith.constant 0 : i32
    %c0_i32_0 = arith.constant 0 : i32
    %c0_i32_1 = arith.constant 0 : i32
    return %c0_i32, %c0_i32_0 : i32, i32
  }
  func.func @transform_3(%arg0: i32) -> (i32, i32) {
    %c0_i32 = arith.constant 0 : i32
    %c0_i32_0 = arith.constant 0 : i32
    return %arg0, %c0_i32 : i32, i32
  }
}

</mosaic_0001>

<bundles_post_ra>
// kernel: tpu_custom_call.1
= control target key start
LH: loop header
LB: loop body
LE: loop exit
PB: predicated region body
PF: predicated region fallthrough
CT: control target
= control target key end

     0   :  { %8 = vsyncpa [#allocation3], 0  ;;  %s938_s0 = inlined_call_operand.hbm [shape: f32[2,784], index: 0, kind: input, shape index: {}]   ;;  %s939_s1 = inlined_call_operand.hbm [shape: f32[784,128], index: 1, kind: input, shape index: {}]   ;;  %s940_s2 = inlined_call_operand.vmem [shape: f32[1,128], index: 2, kind: input, shape index: {}]   ;;  %s941_s3 = inlined_call_operand.hbm [shape: f32[2,128], index: 3, kind: output, shape index: {}]  }
   0x1   :  { %9 = vsyncpa [#allocation6], 0 }
   0x2   :  { %10 = vsyncpa [#allocation4], 0 }
   0x3   :  { %15 = vsyncadd [#allocation3], 672  ;;  %s856_s12 = smov [#allocation2]   ;;  %s784_s16 = scalar_lea.hbm %s938_s0, 224 }
   0x4   :  { %s16_s13 = sshll.u32 %s856_s12, 4  ;;  %p785_p0 = scmp.ne.s32.totalorder %s938_s0, %s784_s16  ;;  %s17_s13 = int_to_ptr.vmem [resolvable:$true] %s16_s13 }
   0x5   :  { %p788_p1 = scmp.lt.u32.totalorder %s784_s16, %s938_s0 }
   0x7   :  { %p790_p2 = pnand %p788_p1, %p785_p0 }
   0x9   :  { %793 = shalt.err (!%p790_p2)
}
   0xa   :  { %s794_s21 = scalar_lea.vmem %s17_s13, 224  ;;  %s798_s22 = scalar_lea.vmem %s17_s13, 896 }
   0xb   :  { %p795_p3 = scmp.ne.s32.totalorder %s17_s13, %s794_s21  ;;  %p799_p4 = scmp.lt.s32.totalorder %s17_s13, %s17_s13 }
   0xc   :  { %p800_p5 = scmp.lt.s32.totalorder %s798_s22, %s794_s21 }
   0xe   :  { %p801_p6 = por %p800_p5, %p799_p4 }
  0x10   :  { %p802_p7 = pnand %p801_p6, %p795_p3 }
  0x12   :  { %805 = shalt.err (!%p802_p7)
}
  0x13   :  { %s857_s23 = smov 224   ;;  %s858_s24 = smov 14  }
  0x14   :  { %22 = dma.hbm_to_vmem [thread:$0]  %s938_s0, 224, %s17_s13, [#allocation3], %s857_s23, %s857_s23, %s858_s24  }
  0x15   :  { %s859_s27 = smov [#allocation5]   ;;  %s806_s4 = scalar_lea.hbm %s939_s1, 12544 }
  0x16   :  { %s28_s28 = sshll.u32 %s859_s27, 4  ;;  %p807_p8 = scmp.ne.s32.totalorder %s939_s1, %s806_s4  ;;  %s29_s28 = int_to_ptr.vmem [resolvable:$true] %s28_s28 }
  0x17   :  { %p810_p9 = scmp.lt.u32.totalorder %s806_s4, %s939_s1 }
  0x19   :  { %p812_p10 = pnand %p810_p9, %p807_p8 }
  0x1b   :  { %815 = shalt.err (!%p812_p10)
}
  0x1c   :  { %s816_s9 = scalar_lea.vmem %s29_s28, 12544  ;;  %p821_p12 = scmp.lt.s32.totalorder %s29_s28, %s29_s28 }
  0x1d   :  { %p817_p11 = scmp.ne.s32.totalorder %s29_s28, %s816_s9  ;;  %p822_p13 = scmp.lt.s32.totalorder %s816_s9, %s816_s9 }
  0x1f   :  { %p823_p0 = por %p822_p13, %p821_p12 }
  0x21   :  { %p824_p1 = pnand %p823_p0, %p817_p11 }
  0x23   :  { %827 = shalt.err (!%p824_p1)
}
  0x24   :  { %s860_s0 = smov 128   ;;  %s861_s10 = smov 8  }
  0x25   :  { %34 = dma.hbm_to_vmem [thread:$0]  %s939_s1, 12544, %s29_s28, [#allocation6], %s860_s0, %s860_s0, %s861_s10  }
  0x26   :  { %850 = dma.done.wait [#allocation3], 896  }
  0x27   :  { %851 = vsyncadd [#allocation3], 4294966400 }
  0x28   :  { %852 = dma.done.wait [#allocation6], 12544  }
  0x29   :  { %853 = vsyncadd [#allocation6], 4294954752  ;;  %v67_v0 = vld [vmem:[#allocation5 + $0x80] sm:$0xff]  ;;  %v68_v1 = vld [vmem:[#allocation5 + $0x88] sm:$0xff]  ;;  %v862_v51 = vmov 1983009808   ;;  %v171_v53 = vlaneseq }
  0x2a   :  { %v51_v2 = vld [vmem:[#allocation5] sm:$0xff]  ;;  %v660_v3 = vpack.c.bf16 %v68_v1, %v67_v0  ;;  %v52_v4 = vld [vmem:[#allocation5 + $0x8] sm:$0xff]  ;;  %v69_v11 = vld [vmem:[#allocation5 + $0x90] sm:$0xff]  ;;  %v169_v52 = vunpack.c.l.s4 %v862_v51  ;;  %vm864_vm0 = vmmov 0   ;;  %vm241_vm1 = vcmask 130048  }
  0x2b   :  { %v99_v5 = vld [vmem:[#allocation5 + $0x180] sm:$0xff]  ;;  %v100_v6 = vld [vmem:[#allocation5 + $0x188] sm:$0xff]  ;;  %v662_v7 = vpack.c.bf16 %v52_v4, %v51_v2  ;;  %v70_v13 = vld [vmem:[#allocation5 + $0x98] sm:$0xff] }
  0x2c   :  { %v692_v8 = vpack.c.bf16 %v100_v6, %v99_v5  ;;  %v83_v9 = vld [vmem:[#allocation5 + $0x100] sm:$0xff]  ;;  %v84_v10 = vld [vmem:[#allocation5 + $0x108] sm:$0xff]  ;;  %661 = vmatprep.subr.bf16.mxu0 %v660_v3  ;;  %v53_v14 = vld [vmem:[#allocation5 + $0x10] sm:$0xff]  ;;  %v664_v16 = vpack.c.bf16 %v70_v13, %v69_v11  ;;  %v170_v2 = vunpack.c.0.s8 %v169_v52  ;;  %v172_v3 = vshrl.u32 %v171_v53, 7 }
  0x2d   :  { %v694_v12 = vpack.c.bf16 %v84_v10, %v83_v9  ;;  %v54_v15 = vld [vmem:[#allocation5 + $0x18] sm:$0xff]  ;;  %663 = vmatpush3.bf16.msra.mxu0 %v662_v7  ;;  %v101_v18 = vld [vmem:[#allocation5 + $0x190] sm:$0xff]  ;;  %v71_v23 = vld [vmem:[#allocation5 + $0xa0] sm:$0xff] }
  0x2e   :  { %693 = vmatprep.subr.bf16.mxu1 %v692_v8  ;;  %v666_v17 = vpack.c.bf16 %v54_v15, %v53_v14  ;;  %v102_v19 = vld [vmem:[#allocation5 + $0x198] sm:$0xff]  ;;  %v85_v20 = vld [vmem:[#allocation5 + $0x110] sm:$0xff]  ;;  %v72_v24 = vld [vmem:[#allocation5 + $0xa8] sm:$0xff]  ;;  %665 = vmatprep.subr.bf16.mxu0 %v664_v16 }
  0x2f   :  { %695 = vmatpush3.bf16.msra.mxu1 %v694_v12  ;;  %v696_v21 = vpack.c.bf16 %v102_v19, %v101_v18  ;;  %v86_v22 = vld [vmem:[#allocation5 + $0x118] sm:$0xff]  ;;  %v668_v26 = vpack.c.bf16 %v72_v24, %v71_v23  ;;  %v55_v27 = vld [vmem:[#allocation5 + $0x20] sm:$0xff]  ;;  %v56_v28 = vld [vmem:[#allocation5 + $0x28] sm:$0xff] }
  0x30   :  { %v698_v25 = vpack.c.bf16 %v86_v22, %v85_v20  ;;  %v103_v29 = vld [vmem:[#allocation5 + $0x1a0] sm:$0xff]  ;;  %v104_v30 = vld [vmem:[#allocation5 + $0x1a8] sm:$0xff]  ;;  %v670_v33 = vpack.c.bf16 %v56_v28, %v55_v27  ;;  %v73_v35 = vld [vmem:[#allocation5 + $0xb0] sm:$0xff] }
  0x31   :  { %697 = vmatprep.subr.bf16.mxu1 %v696_v21  ;;  %v87_v31 = vld [vmem:[#allocation5 + $0x120] sm:$0xff]  ;;  %v88_v32 = vld [vmem:[#allocation5 + $0x128] sm:$0xff]  ;;  %667 = vmatpush3.bf16.msra.mxu0 %v666_v17  ;;  %v700_v34 = vpack.c.bf16 %v104_v30, %v103_v29  ;;  %v74_v36 = vld [vmem:[#allocation5 + $0xb8] sm:$0xff]  ;;  %v913_v21 = vsub.s32 %v170_v2, %v172_v3 }
  0x32   :  { %v57_v37 = vld [vmem:[#allocation5 + $0x30] sm:$0xff]  ;;  %669 = vmatprep.subr.bf16.mxu0 %v668_v26  ;;  %v702_v38 = vpack.c.bf16 %v88_v32, %v87_v31  ;;  %v672_v39 = vpack.c.bf16 %v74_v36, %v73_v35  ;;  %v58_v40 = vld [vmem:[#allocation5 + $0x38] sm:$0xff]  ;;  %v75_v46 = vld [vmem:[#allocation5 + $0xc0] sm:$0xff] }
  0x33   :  { %699 = vmatpush3.bf16.msra.mxu1 %v698_v25  ;;  %v105_v41 = vld [vmem:[#allocation5 + $0x1b0] sm:$0xff]  ;;  %v106_v42 = vld [vmem:[#allocation5 + $0x1b8] sm:$0xff]  ;;  %v76_v47 = vld [vmem:[#allocation5 + $0xc8] sm:$0xff]  ;;  %v674_v48 = vpack.c.bf16 %v58_v40, %v57_v37 }
  0x34   :  { %701 = vmatprep.subr.bf16.mxu1 %v700_v34  ;;  %v704_v43 = vpack.c.bf16 %v106_v42, %v105_v41  ;;  %v89_v44 = vld [vmem:[#allocation5 + $0x130] sm:$0xff]  ;;  %v90_v45 = vld [vmem:[#allocation5 + $0x138] sm:$0xff]  ;;  %v107_v49 = vld [vmem:[#allocation5 + $0x1c0] sm:$0xff]  ;;  %v676_v55 = vpack.c.bf16 %v76_v47, %v75_v46 }
  0x35   :  { %671 = vmatpush3.bf16.msra.mxu0 %v670_v33  ;;  %v108_v50 = vld [vmem:[#allocation5 + $0x1c8] sm:$0xff]  ;;  %v706_v54 = vpack.c.bf16 %v90_v45, %v89_v44  ;;  %v59_v56 = vld [vmem:[#allocation5 + $0x40] sm:$0xff]  ;;  %v77_v61 = vld [vmem:[#allocation5 + $0xd0] sm:$0xff] }
  0x36   :  { %673 = vmatprep.subr.bf16.mxu0 %v672_v39  ;;  %v60_v57 = vld [vmem:[#allocation5 + $0x48] sm:$0xff]  ;;  %v91_v58 = vld [vmem:[#allocation5 + $0x140] sm:$0xff]  ;;  %v708_v59 = vpack.c.bf16 %v108_v50, %v107_v49  ;;  %v78_v62 = vld [vmem:[#allocation5 + $0xd8] sm:$0xff] }
  0x37   :  { %703 = vmatpush3.bf16.msra.mxu1 %v702_v38  ;;  %v92_v60 = vld [vmem:[#allocation5 + $0x148] sm:$0xff]  ;;  %v109_v63 = vld [vmem:[#allocation5 + $0x1d0] sm:$0xff]  ;;  %v110_v0 = vld [vmem:[#allocation5 + $0x1d8] sm:$0xff]  ;;  %v678_v1 = vpack.c.bf16 %v60_v57, %v59_v56  ;;  %v680_v5 = vpack.c.bf16 %v78_v62, %v77_v61 }
  0x38   :  { %705 = vmatprep.subr.bf16.mxu1 %v704_v43  ;;  %v710_v4 = vpack.c.bf16 %v92_v60, %v91_v58  ;;  %v61_v6 = vld [vmem:[#allocation5 + $0x50] sm:$0xff]  ;;  %v62_v7 = vld [vmem:[#allocation5 + $0x58] sm:$0xff]  ;;  %v712_v9 = vpack.c.bf16 %v110_v0, %v109_v63  ;;  %v79_v11 = vld [vmem:[#allocation5 + $0xe0] sm:$0xff]  ;;  %v863_v63 = vmov 0.0|0.0  }
  0x39   :  { %675 = vmatpush3.bf16.msra.mxu0 %v674_v48  ;;  %v93_v8 = vld [vmem:[#allocation5 + $0x150] sm:$0xff]  ;;  %v94_v10 = vld [vmem:[#allocation5 + $0x158] sm:$0xff]  ;;  %v80_v12 = vld [vmem:[#allocation5 + $0xe8] sm:$0xff]  ;;  %v682_v17 = vpack.c.bf16 %v62_v7, %v61_v6 }
  0x3a   :  { %677 = vmatprep.subr.bf16.mxu0 %v676_v55  ;;  %v63_v13 = vld [vmem:[#allocation5 + $0x60] sm:$0xff]  ;;  %v64_v14 = vld [vmem:[#allocation5 + $0x68] sm:$0xff]  ;;  %v81_v20 = vld [vmem:[#allocation5 + $0xf0] sm:$0xff]  ;;  %v714_v22 = vpack.c.bf16 %v94_v10, %v93_v8  ;;  %v684_v23 = vpack.c.bf16 %v80_v12, %v79_v11  ;;  %v865_v10 = vmov 0.0  }
  0x3b   :  { %707 = vmatpush3.bf16.msra.mxu1 %v706_v54  ;;  %v111_v15 = vld [vmem:[#allocation5 + $0x1e0] sm:$0xff]  ;;  %v112_v16 = vld [vmem:[#allocation5 + $0x1e8] sm:$0xff]  ;;  %v82_v25 = vld [vmem:[#allocation5 + $0xf8] sm:$0xff]  ;;  %v686_v30 = vpack.c.bf16 %v64_v14, %v63_v13 }
  0x3c   :  { %709 = vmatprep.subr.bf16.mxu1 %v708_v59  ;;  %v95_v18 = vld [vmem:[#allocation5 + $0x160] sm:$0xff]  ;;  %v96_v19 = vld [vmem:[#allocation5 + $0x168] sm:$0xff]  ;;  %v716_v24 = vpack.c.bf16 %v112_v16, %v111_v15  ;;  %v113_v28 = vld [vmem:[#allocation5 + $0x1f0] sm:$0xff]  ;;  %v688_v36 = vpack.c.bf16 %v82_v25, %v81_v20 }
  0x3d   :  { %679 = vmatpush3.bf16.msra.mxu0 %v678_v1  ;;  %v772_v26 = vld [vmem:[#allocation2] ss:$14 sps:$4 sm:$0xff]   ;;  %v774_v27 = vld [vmem:[#allocation2 + $0x1c] ss:$14 sps:$4 sm:$0xff]   ;;  %v776_v33 = vld [vmem:[#allocation2 + $0x4] ss:$14 sps:$4 sm:$0xff]   ;;  %v718_v35 = vpack.c.bf16 %v96_v19, %v95_v18 }
  0x3e   :  { %681 = vmatprep.subr.bf16.mxu0 %v680_v5  ;;  %v114_v29 = vld [vmem:[#allocation5 + $0x1f8] sm:$0xff]  ;;  %v174_v31 = vrot.slane %v772_v26, %v913_v21  ;;  %v188_v32 = vrot.slane %v774_v27, %v913_v21  ;;  %v65_v37 = vld [vmem:[#allocation5 + $0x70] sm:$0xff]  ;;  %v131_v43 = vld [vmem:[#allocation5 + $0x280] sm:$0xff]  ;;  %v181_v45 = vrot.slane %v776_v33, %v913_v21 }
  0x3f   :  { %711 = vmatpush3.bf16.msra.mxu1 %v710_v4  ;;  %v777_v34 = vld [vmem:[#allocation2 + $0x20] ss:$14 sps:$4 sm:$0xff]   ;;  %v720_v40 = vpack.c.bf16 %v114_v29, %v113_v28  ;;  %v115_v51 = vld [vmem:[#allocation5 + $0x200] sm:$0xff]  ;;  %v781_v7 = vld [vmem:[#allocation2 + $0x24] ss:$14 sps:$4 sm:$0xff]  }
  0x40   :  { %713 = vmatprep.subr.bf16.mxu1 %v712_v9  ;;  %v66_v38 = vld [vmem:[#allocation5 + $0x78] sm:$0xff]  ;;  %v97_v39 = vld [vmem:[#allocation5 + $0x170] sm:$0xff]  ;;  %v197_v41 = vcombine.high %v174_v31, %v188_v32  ;;  %v132_v44 = vld [vmem:[#allocation5 + $0x288] sm:$0xff]  ;;  %v195_v46 = vrot.slane %v777_v34, %v913_v21  ;;  %v196_v55 = vcombine.low %v174_v31, %v188_v32  ;;  %v224_v16 = vrot.slane %v781_v7, %v913_v21 }
  0x41   :  { %683 = vmatpush3.bf16.msra.mxu0 %v682_v17  ;;  %v98_v42 = vld [vmem:[#allocation5 + $0x178] sm:$0xff]  ;;  %v690_v47 = vpack.c.bf16 %v66_v38, %v65_v37  ;;  %v724_v50 = vpack.c.bf16 %v132_v44, %v131_v43  ;;  %v116_v52 = vld [vmem:[#allocation5 + $0x208] sm:$0xff]  ;;  %v133_v53 = vld [vmem:[#allocation5 + $0x290] sm:$0xff] }
  0x42   :  { %685 = vmatprep.subr.bf16.mxu0 %v684_v23  ;;  %308 = vmatprep.mubr.f32.mxu0 %v197_v41  ;;  %v199_v48 = vcombine.high %v181_v45, %v195_v46  ;;  %v722_v49 = vpack.c.bf16 %v98_v42, %v97_v39  ;;  %v134_v54 = vld [vmem:[#allocation5 + $0x298] sm:$0xff]  ;;  %v726_v56 = vpack.c.bf16 %v116_v52, %v115_v51  ;;  %v117_v59 = vld [vmem:[#allocation5 + $0x210] sm:$0xff]  ;;  %v135_v61 = vld [vmem:[#allocation5 + $0x2a0] sm:$0xff] }
  0x43   :  { %715 = vmatpush3.bf16.msra.mxu1 %v714_v22  ;;  %v198_v57 = vcombine.low %v181_v45, %v195_v46  ;;  %v728_v58 = vpack.c.bf16 %v134_v54, %v133_v53  ;;  %v118_v60 = vld [vmem:[#allocation5 + $0x218] sm:$0xff]  ;;  %v136_v62 = vld [vmem:[#allocation5 + $0x2a8] sm:$0xff]  ;;  %v119_v0 = vld [vmem:[#allocation5 + $0x220] sm:$0xff] }
  0x44   :  { %717 = vmatprep.subr.bf16.mxu1 %v716_v24  ;;  %378 = vmatprep.mubr.f32.mxu1 %v199_v48  ;;  %v120_v1 = vld [vmem:[#allocation5 + $0x228] sm:$0xff]  ;;  %v730_v2 = vpack.c.bf16 %v118_v60, %v117_v59  ;;  %v778_v3 = vld [vmem:[#allocation2 + $0x8] ss:$14 sps:$4 sm:$0xff]   ;;  %v780_v4 = vld [vmem:[#allocation2 + $0xc] ss:$14 sps:$4 sm:$0x33]   ;;  %v732_v6 = vpack.c.bf16 %v136_v62, %v135_v61 }
  0x45   :  { %687 = vmatpush3.bf16.msra.mxu0 %v686_v30  ;;  %v147_v5 = vld [vmem:[#allocation5 + $0x300] sm:$0xff]  ;;  %v783_v8 = vld [vmem:[#allocation2 + $0x28] ss:$14 sps:$4 sm:$0x33]   ;;  %v148_v9 = vld [vmem:[#allocation5 + $0x308] sm:$0xff]  ;;  %v210_v13 = vrot.slane %v778_v3, %v913_v21  ;;  %v217_v14 = vrot.slane %v780_v4, %v913_v21  ;;  %v734_v18 = vpack.c.bf16 %v120_v1, %v119_v0 }
  0x46   :  { %689 = vmatprep.subr.bf16.mxu0 %v688_v36  ;;  %v137_v11 = vld [vmem:[#allocation5 + $0x2b0] sm:$0xff]  ;;  %v138_v12 = vld [vmem:[#allocation5 + $0x2b8] sm:$0xff]  ;;  %v757_v15 = vpack.c.bf16 %v148_v9, %v147_v5  ;;  %v231_v17 = vrot.slane %v783_v8, %v913_v21  ;;  %v139_v25 = vld [vmem:[#allocation5 + $0x2c0] sm:$0xff] }
  0x47   :  { %719 = vmatpush3.bf16.msra.mxu1 %v718_v35  ;;  %v736_v19 = vpack.c.bf16 %v138_v12, %v137_v11  ;;  %v121_v20 = vld [vmem:[#allocation5 + $0x230] sm:$0xff]  ;;  %v122_v22 = vld [vmem:[#allocation5 + $0x238] sm:$0xff]  ;;  %v233_v23 = vcombine.high %v210_v13, %v224_v16  ;;  %v140_v26 = vld [vmem:[#allocation5 + $0x2c8] sm:$0xff] }
  0x48   :  { %721 = vmatprep.subr.bf16.mxu1 %v720_v40  ;;  %v234_v24 = vcombine.low %v217_v14, %v231_v17  ;;  %v738_v27 = vpack.c.bf16 %v122_v22, %v121_v20  ;;  %v740_v28 = vpack.c.bf16 %v140_v26, %v139_v25  ;;  %v123_v29 = vld [vmem:[#allocation5 + $0x240] sm:$0xff]  ;;  %v124_v21 = vld [vmem:[#allocation5 + $0x248] sm:$0xff]  ;;  %v141_v30 = vld [vmem:[#allocation5 + $0x2d0] sm:$0xff] }
  0x49   :  { %691 = vmatpush3.bf16.msra.mxu0 %v690_v47  ;;  %v142_v31 = vld [vmem:[#allocation5 + $0x2d8] sm:$0xff]  ;;  %v742_v32 = vpack.c.bf16 %v124_v21, %v123_v29  ;;  %v125_v34 = vld [vmem:[#allocation5 + $0x250] sm:$0xff]  ;;  %v143_v36 = vld [vmem:[#allocation5 + $0x2e0] sm:$0xff] }
  0x4a   :  { %725 = vmatprep.subr.bf16.mxu0 %v724_v50  ;;  %v744_v33 = vpack.c.bf16 %v142_v31, %v141_v30  ;;  %v126_v35 = vld [vmem:[#allocation5 + $0x258] sm:$0xff]  ;;  %v144_v37 = vld [vmem:[#allocation5 + $0x2e8] sm:$0xff]  ;;  %v127_v40 = vld [vmem:[#allocation5 + $0x260] sm:$0xff] }
  0x4b   :  { %723 = vmatpush3.bf16.msra.mxu1 %v722_v49  ;;  %v746_v38 = vpack.c.bf16 %v126_v35, %v125_v34  ;;  %v748_v39 = vpack.c.bf16 %v144_v37, %v143_v36  ;;  %v128_v41 = vld [vmem:[#allocation5 + $0x268] sm:$0xff]  ;;  %v145_v42 = vld [vmem:[#allocation5 + $0x2f0] sm:$0xff]  ;;  %v146_v43 = vld [vmem:[#allocation5 + $0x2f8] sm:$0xff]  ;;  %v232_v49 = vcombine.low %v210_v13, %v224_v16 }
  0x4c   :  { %756 = vmatprep.subr.bf16.mxu1 %v863_v63  ;;  %309 = vmatmul.mubr.f32.vlgmr.msra.gmra.mrb[0].mxu0 %v196_v55  ;;  %v750_v44 = vpack.c.bf16 %v128_v41, %v127_v40  ;;  %v752_v45 = vpack.c.bf16 %v146_v43, %v145_v42  ;;  %v129_v46 = vld [vmem:[#allocation5 + $0x270] sm:$0xff]  ;;  %v130_v47 = vld [vmem:[#allocation5 + $0x278] sm:$0xff]  ;;  %v543_v51 = vld [vmem:[%s940_s2] ss:$0 sm:$0xff] }
  0x4d   :  { %727 = vmatpush3.bf16.msra.mxu0 %v726_v56  ;;  %448 = vmatprep.mubr.f32.mxu0 %v233_v23  ;;  %v754_v48 = vpack.c.bf16 %v130_v47, %v129_v46 }
  0x4e   :  { %379 = vmatmul.mubr.f32.vlgmr.msra.gmra.mrb[0].mxu1 %v198_v57  ;;  %729 = vmatprep.subr.bf16.mxu0 %v728_v58 }
  0x4f   :  { %657 = vmatprep.mubr.msk.f32.mxu1 %vm864_vm0, %v865_v10  ;;  %758 = vmatpush3.bf16.msra.mxu1 %v757_v15 }
  0x51   :  { %731 = vmatpush3.bf16.msra.mxu0 %v730_v2 }
  0x52   :  { %733 = vmatprep.subr.bf16.mxu0 %v732_v6  ;;  %658 = vmatmul.mubr.msk.f32.vlgmr.msra.gmra.mrb[2].mxu1 %vm241_vm1, %v234_v24 }
  0x55   :  { %735 = vmatpush3.bf16.msra.mxu0 %v734_v18 }
  0x56   :  { %737 = vmatprep.subr.bf16.mxu0 %v736_v19 }
  0x59   :  { %739 = vmatpush3.bf16.msra.mxu0 %v738_v27 }
  0x5a   :  { %741 = vmatprep.subr.bf16.mxu0 %v740_v28 }
  0x5d   :  { %743 = vmatpush3.bf16.msra.mxu0 %v742_v32 }
  0x5e   :  { %745 = vmatprep.subr.bf16.mxu0 %v744_v33 }
  0x61   :  { %747 = vmatpush3.bf16.msra.mxu0 %v746_v38 }
  0x62   :  { %749 = vmatprep.subr.bf16.mxu0 %v748_v39 }
  0x65   :  { %751 = vmatpush3.bf16.msra.mxu0 %v750_v44 }
  0x66   :  { %753 = vmatprep.subr.bf16.mxu0 %v752_v45 }
  0x69   :  { %755 = vmatpush3.bf16.msra.mxu0 %v754_v48 }
  0x6c   :  { %449 = vmatmul.mubr.f32.vlgmr.msra.gmra.mrb[2].mxu0 %v232_v49 }
 0x11f   :  { %v577_v50 = vpop.f32.mrb[0].mxu0 }
 0x120   :  { %v578_v52 = vpop.f32.mrb[1].mxu0 }
 0x121   :  { %v612_v53 = vpop.f32.mrb[0].mxu1  ;;  %v579_v54 = vadd.f32 %v578_v52, %v577_v50 }
 0x122   :  { %v613_v55 = vpop.f32.mrb[1].mxu1 }
 0x123   :  { %v614_v56 = vadd.f32 %v613_v55, %v612_v53  ;;  %v311_v57 = vadd.f32 %v579_v54, %v543_v51 }
 0x125   :  { %v381_v58 = vadd.f32 %v614_v56, %v311_v57  ;;  %v520_v59 = vpop.f32.mrb[2].mxu1 }
 0x126   :  { %v659_v60 = vpop.f32.mrb[3].mxu1 }
 0x13f   :  { %v647_v61 = vpop.f32.mrb[2].mxu0 }
 0x140   :  { %v648_v62 = vpop.f32.mrb[3].mxu0 }
 0x141   :  { %v649_v63 = vadd.f32 %v648_v62, %v647_v61 }
 0x143   :  { %v451_v0 = vadd.f32 %v649_v63, %v381_v58 }
 0x145   :  { %v521_v1 = vadd.f32 %v520_v59, %v451_v0 }
 0x147   :  { %524 = vst [vmem:[#allocation7] sm:$0xff] %v521_v1 }
 0x148   :  { %529 = vsyncadd [#allocation4], 96  ;;  %s866_s14 = smov [#allocation7]  }
 0x149   :  { %s530_s15 = sshll.u32 %s866_s14, 4  ;;  %s531_s15 = int_to_ptr.vmem [resolvable:$true] %s530_s15 }
 0x14a   :  { %s828_s2 = scalar_lea.vmem %s531_s15, 32  ;;  %s832_s16 = scalar_lea.vmem %s531_s15, 128 }
 0x14b   :  { %p829_p2 = scmp.ne.s32.totalorder %s531_s15, %s828_s2  ;;  %p833_p3 = scmp.lt.s32.totalorder %s531_s15, %s531_s15 }
 0x14c   :  { %p834_p4 = scmp.lt.s32.totalorder %s832_s16, %s828_s2 }
 0x14e   :  { %p835_p5 = por %p834_p4, %p833_p3 }
 0x150   :  { %p836_p6 = pnand %p835_p5, %p829_p2 }
 0x152   :  { %839 = shalt.err (!%p836_p6)
}
 0x153   :  { %s840_s19 = scalar_lea.hbm %s941_s3, 32 }
 0x154   :  { %p841_p7 = scmp.ne.s32.totalorder %s941_s3, %s840_s19  ;;  %p844_p8 = scmp.lt.u32.totalorder %s840_s19, %s941_s3 }
 0x156   :  { %p846_p9 = pnand %p844_p8, %p841_p7 }
 0x158   :  { %849 = shalt.err (!%p846_p9)
}
 0x159   :  { %s867_s24 = smov 32   ;;  %s868_s25 = smov 2  }
 0x15a   :  { %536 = dma.vmem_to_hbm [thread:$0]  %s531_s15, 32, %s941_s3, [#allocation4], %s867_s24, %s867_s24, %s868_s25  }
 0x15b   :  { %854 = dma.done.wait [#allocation4], 128  }
 0x15c   :  { %855 = vsyncadd [#allocation4], 4294967168 }
 0x15d   :  { %540 = vsyncpa [#allocation3], 1 }
 0x15e   :  { %541 = vsyncpa [#allocation6], 1 }
 0x15f   :  { %542 = vsyncpa [#allocation4], 1 }

</bundles_post_ra>
